<compile_context>
chip_gen: v7x
topology: tpu7x:2x2x1
jax: 0.10.0
libtpu: 0.0.40
codegen_flags: <defaults>
</compile_context>

<pallas_src>
import functools
import math

import jax
import jax.numpy as jnp
from jax.experimental import pallas as pl
from jax.experimental.pallas import tpu as pltpu


def _layernorm(x, gamma, beta, eps=1e-5):
    mu = jnp.mean(x, axis=-1, keepdims=True)
    var = jnp.mean((x - mu) ** 2, axis=-1, keepdims=True)
    return (x - mu) * jax.lax.rsqrt(var + eps) * gamma + beta


def _silu(x):
    # x * sigmoid(x); exp + approximate reciprocal both go to the EUP slot.
    return x * pl.reciprocal(1.0 + jnp.exp(-x), approx=True)


def tr_layer_kernel(seq_ref, g1_ref, b1_ref, wqkv_ref, bqkv_ref,
                    wout_ref, bout_ref, g2_ref, b2_ref, wmlp_ref, bmlp_ref,
                    out_ref, *, num_heads, emb_size, units):
    x = seq_ref[...]                       # (R, H) with R = Bt * NU rows
    R, H = x.shape
    E = num_heads * emb_size
    Bt = R // units

    # ---- attention branch: seq + silu(out_proj(attn(fused_qkv(LN(seq))))) ------
    ln1 = _layernorm(x, g1_ref[...], b1_ref[...])
    # seq_qkv_linear and MHA in_proj fused into one (H, 3E) projection on the
    # host; the 1/sqrt(emb_size) query scale is folded into its q slice.
    qkv = jnp.dot(ln1, wqkv_ref[...],
                  preferred_element_type=jnp.float32) + bqkv_ref[...]
    qkv3 = qkv.reshape(Bt, units, 3 * E)   # leading split only; lane dim unchanged

    head_outs = []
    for h in range(num_heads):             # static unroll over heads
        lo = h * emb_size
        qh = qkv3[:, :, lo:lo + emb_size]
        kh = qkv3[:, :, E + lo:E + lo + emb_size]
        vh = qkv3[:, :, 2 * E + lo:2 * E + lo + emb_size]
        s = jnp.einsum('bqe,bke->bqk', qh, kh,
                       preferred_element_type=jnp.float32)
        s = s - jnp.max(s, axis=-1, keepdims=True)
        p = jnp.exp(s)
        p = p * pl.reciprocal(jnp.sum(p, axis=-1, keepdims=True), approx=True)
        head_outs.append(jnp.einsum('bqk,bke->bqe', p, vh,
                                    preferred_element_type=jnp.float32))
    # keep per-head results in registers; single concat feeds out_proj directly
    attn_heads = jnp.concatenate(head_outs, axis=-1).reshape(R, E)
    attn = jnp.dot(attn_heads, wout_ref[...],
                   preferred_element_type=jnp.float32) + bout_ref[...]
    x1 = x + _silu(attn)

    # ---- mlp branch: x1 + silu(Linear(LN(x1))) ---------------------------------
    ln2 = _layernorm(x1, g2_ref[...], b2_ref[...])
    mlp = _silu(jnp.dot(ln2, wmlp_ref[...],
                        preferred_element_type=jnp.float32) + bmlp_ref[...])

    out_ref[...] = x1 + mlp


def init_params(key, hidden_size, emb_size, num_heads):
    H = hidden_size
    E = num_heads * emb_size
    keys = jax.random.split(key, 6)

    def unif(k, shape, fan_in):
        bound = 1.0 / math.sqrt(fan_in)
        return jax.random.uniform(k, shape, jnp.float32, -bound, bound)

    # Linear weights stored pre-transposed as (in, out) so kernels do x @ W.
    return dict(
        ln1_g=jnp.ones((1, H), jnp.float32),
        ln1_b=jnp.zeros((1, H), jnp.float32),
        w_qkv=unif(keys[0], (H, 3 * E), H),      # seq_qkv_linear.weight^T
        b_qkv=unif(keys[1], (1, 3 * E), H),
        w_in=unif(keys[2], (E, 3 * E), E),       # attn.in_proj_weight^T
        b_in=jnp.zeros((1, 3 * E), jnp.float32),
        w_out=unif(keys[3], (E, E), E),          # attn.out_proj.weight^T
        b_out=jnp.zeros((1, E), jnp.float32),
        ln2_g=jnp.ones((1, H), jnp.float32),
        ln2_b=jnp.zeros((1, H), jnp.float32),
        w_mlp=unif(keys[4], (H, H), H),
        b_mlp=unif(keys[5], (1, H), H),
    )


def _fuse_qkv_in_proj(w_qkv, b_qkv, w_in, b_in, num_heads, emb_size):
    """Fold (seq_qkv_linear -> MHA in_proj) into one (H, 3E) weight + bias.
    Also folds the 1/sqrt(emb_size) query scaling into the q slice."""
    E = num_heads * emb_size
    scale = 1.0 / math.sqrt(emb_size)
    w_parts, b_parts = [], []
    for i in range(3):
        s = slice(i * E, (i + 1) * E)
        w = w_qkv[:, s] @ w_in[:, s]                       # (H, E)
        b = b_qkv[:, s] @ w_in[:, s] + b_in[:, s]          # (1, E)
        if i == 0:                                         # q slice gets the scale
            w = w * scale
            b = b * scale
        w_parts.append(w)
        b_parts.append(b)
    return jnp.concatenate(w_parts, axis=1), jnp.concatenate(b_parts, axis=1)


def _pick_block_batch(B, NU, target_rows=256):
    """Largest divisor of B with Bt*NU <= target_rows; prefer an even grid
    length (v7x has 2 TensorCores sharing the 'parallel' grid axis)."""
    cands = [d for d in range(1, B + 1) if B % d == 0 and d * NU <= target_rows]
    if not cands:
        return 1
    even = [d for d in cands if (B // d) == 1 or (B // d) % 2 == 0]
    return max(even) if even else max(cands)


def tr_layer(seq, params, num_heads, emb_size):
    B, NU, H = seq.shape
    E = num_heads * emb_size
    assert E == H, "module's assert implies num_heads * emb_size == hidden_size"

    w_fused, b_fused = _fuse_qkv_in_proj(params['w_qkv'], params['b_qkv'],
                                         params['w_in'], params['b_in'],
                                         num_heads, emb_size)

    Bt = _pick_block_batch(B, NU)
    grid = (B // Bt,)
    R = Bt * NU

    seq2d = seq.reshape(B * NU, H)     # flatten host-side: matmul M = Bt*NU rows

    plist = [params['ln1_g'], params['ln1_b'], w_fused, b_fused,
             params['w_out'], params['b_out'],
             params['ln2_g'], params['ln2_b'],
             params['w_mlp'], params['b_mlp']]

    kernel = functools.partial(tr_layer_kernel, num_heads=num_heads,
                               emb_size=emb_size, units=NU)

    in_specs = [pl.BlockSpec((R, H), lambda i: (i, 0))]
    for p in plist:
        in_specs.append(pl.BlockSpec(p.shape, lambda i: (0, 0)))

    out2d = pl.pallas_call(
        kernel,
        out_shape=jax.ShapeDtypeStruct((B * NU, H), jnp.float32),
        grid_spec=pltpu.PrefetchScalarGridSpec(
            num_scalar_prefetch=0,
            grid=grid,
            in_specs=in_specs,
            out_specs=pl.BlockSpec((R, H), lambda i: (i, 0)),
        ),
        compiler_params=pltpu.CompilerParams(
            dimension_semantics=("parallel",)),
    )(seq2d, *plist)
    return out2d.reshape(B, NU, H)


def tr_layer_reference(seq, params, num_heads, emb_size):
    """Pure-JAX reference mirroring the PyTorch module (for sanity checking)."""
    B, NU, H = seq.shape
    E = num_heads * emb_size

    def ln(x, g, b):
        mu = jnp.mean(x, -1, keepdims=True)
        var = jnp.mean((x - mu) ** 2, -1, keepdims=True)
        return (x - mu) / jnp.sqrt(var + 1e-5) * g + b

    x = seq
    h1 = ln(x, params['ln1_g'], params['ln1_b'])
    qkv = h1 @ params['w_qkv'] + params['b_qkv']
    q, k, v = qkv[..., :E], qkv[..., E:2 * E], qkv[..., 2 * E:]
    w_in, b_in = params['w_in'], params['b_in']
    q = (q @ w_in[:, :E] + b_in[:, :E]) * (1.0 / math.sqrt(emb_size))
    k = k @ w_in[:, E:2 * E] + b_in[:, E:2 * E]
    v = v @ w_in[:, 2 * E:] + b_in[:, 2 * E:]
    qh = q.reshape(B, NU, num_heads, emb_size)
    kh = k.reshape(B, NU, num_heads, emb_size)
    vh = v.reshape(B, NU, num_heads, emb_size)
    s = jnp.einsum('bqhe,bkhe->bhqk', qh, kh)
    p = jax.nn.softmax(s, axis=-1)
    o = jnp.einsum('bhqk,bkhe->bqhe', p, vh).reshape(B, NU, E)
    attn = o @ params['w_out'] + params['b_out']
    x1 = x + jax.nn.silu(attn)
    h2 = ln(x1, params['ln2_g'], params['ln2_b'])
    return x1 + jax.nn.silu(h2 @ params['w_mlp'] + params['b_mlp'])


if __name__ == "__main__":
    hidden_size, emb_size, num_heads = 32, 8, 4   # hidden = num_heads * emb_size
    B, NU = 2, 8

    key = jax.random.PRNGKey(0)
    kseq, kparams = jax.random.split(key)
    seq = jax.random.normal(kseq, (B, NU, hidden_size), jnp.float32)
    params = init_params(kparams, hidden_size, emb_size, num_heads)

    out = tr_layer(seq, params, num_heads, emb_size)
    jax.block_until_ready(out)
    assert out.shape == seq.shape and out.dtype == jnp.float32

    ref = tr_layer_reference(seq, params, num_heads, emb_size)
    max_err = float(jnp.max(jnp.abs(out - ref)))
    assert max_err < 5e-2, f"mismatch vs reference: {max_err}"

    print("KERNEL_OK")
</pallas_src>

<mosaic_0001>
module attributes {stable_mosaic.version = 11 : i64} {
  func.func @tr_layer_kernel(%arg0: i32, %arg1: memref<16x32xf32, #tpu.memory_space<vmem>>, %arg2: memref<1x32xf32, #tpu.memory_space<vmem>>, %arg3: memref<1x32xf32, #tpu.memory_space<vmem>>, %arg4: memref<32x96xf32, #tpu.memory_space<vmem>>, %arg5: memref<1x96xf32, #tpu.memory_space<vmem>>, %arg6: memref<32x32xf32, #tpu.memory_space<vmem>>, %arg7: memref<1x32xf32, #tpu.memory_space<vmem>>, %arg8: memref<1x32xf32, #tpu.memory_space<vmem>>, %arg9: memref<1x32xf32, #tpu.memory_space<vmem>>, %arg10: memref<32x32xf32, #tpu.memory_space<vmem>>, %arg11: memref<1x32xf32, #tpu.memory_space<vmem>>, %arg12: memref<16x32xf32, #tpu.memory_space<vmem>>) attributes {dimension_semantics = [#tpu.dimension_semantics<parallel>], iteration_bounds = array<i64: 1>, scalar_prefetch = 0 : i64, scratch_operands = 0 : i64, tpu.core_type = #tpu.core_type<tc>, window_params = [{transform_indices = @transform_0, window_bounds = array<i64: 16, 32>}, {pipeline_mode = #tpu.pipeline_mode<synchronous>, transform_indices = @transform_1, window_bounds = array<i64: 1, 32>}, {pipeline_mode = #tpu.pipeline_mode<synchronous>, transform_indices = @transform_2, window_bounds = array<i64: 1, 32>}, {pipeline_mode = #tpu.pipeline_mode<synchronous>, transform_indices = @transform_3, window_bounds = array<i64: 32, 96>}, {pipeline_mode = #tpu.pipeline_mode<synchronous>, transform_indices = @transform_4, window_bounds = array<i64: 1, 96>}, {pipeline_mode = #tpu.pipeline_mode<synchronous>, transform_indices = @transform_5, window_bounds = array<i64: 32, 32>}, {pipeline_mode = #tpu.pipeline_mode<synchronous>, transform_indices = @transform_6, window_bounds = array<i64: 1, 32>}, {pipeline_mode = #tpu.pipeline_mode<synchronous>, transform_indices = @transform_7, window_bounds = array<i64: 1, 32>}, {pipeline_mode = #tpu.pipeline_mode<synchronous>, transform_indices = @transform_8, window_bounds = array<i64: 1, 32>}, {pipeline_mode = #tpu.pipeline_mode<synchronous>, transform_indices = @transform_9, window_bounds = array<i64: 32, 32>}, {pipeline_mode = #tpu.pipeline_mode<synchronous>, transform_indices = @transform_10, window_bounds = array<i64: 1, 32>}, {transform_indices = @transform_11, window_bounds = array<i64: 16, 32>}]} {
    %c0 = arith.constant 0 : index
    %c0_0 = arith.constant 0 : index
    %0 = vector.load %arg1[%c0, %c0_0] : memref<16x32xf32, #tpu.memory_space<vmem>>, vector<16x32xf32>
    %c0_1 = arith.constant 0 : index
    %c0_2 = arith.constant 0 : index
    %1 = vector.load %arg2[%c0_1, %c0_2] : memref<1x32xf32, #tpu.memory_space<vmem>>, vector<1x32xf32>
    %c0_3 = arith.constant 0 : index
    %c0_4 = arith.constant 0 : index
    %2 = vector.load %arg3[%c0_3, %c0_4] : memref<1x32xf32, #tpu.memory_space<vmem>>, vector<1x32xf32>
    %cst = arith.constant dense<0.000000e+00> : vector<16xf32>
    %3 = vector.multi_reduction <add>, %0, %cst [1] : vector<16x32xf32> to vector<16xf32>
    %4 = vector.shape_cast %3 : vector<16xf32> to vector<16x1xf32>
    %cst_5 = arith.constant 3.200000e+01 : f32
    %5 = vector.broadcast %cst_5 : f32 to vector<16x1xf32>
    %6 = arith.divf %4, %5 : vector<16x1xf32>
    %7 = vector.broadcast %6 : vector<16x1xf32> to vector<16x32xf32>
    %8 = arith.subf %0, %7 : vector<16x32xf32>
    %9 = arith.mulf %8, %8 : vector<16x32xf32>
    %cst_6 = arith.constant dense<0.000000e+00> : vector<16xf32>
    %10 = vector.multi_reduction <add>, %9, %cst_6 [1] : vector<16x32xf32> to vector<16xf32>
    %11 = vector.shape_cast %10 : vector<16xf32> to vector<16x1xf32>
    %cst_7 = arith.constant 3.200000e+01 : f32
    %12 = vector.broadcast %cst_7 : f32 to vector<16x1xf32>
    %13 = arith.divf %11, %12 : vector<16x1xf32>
    %14 = vector.broadcast %6 : vector<16x1xf32> to vector<16x32xf32>
    %15 = arith.subf %0, %14 : vector<16x32xf32>
    %cst_8 = arith.constant 9.99999974E-6 : f32
    %16 = vector.broadcast %cst_8 : f32 to vector<16x1xf32>
    %17 = arith.addf %13, %16 : vector<16x1xf32>
    %18 = math.rsqrt %17 : vector<16x1xf32>
    %19 = vector.broadcast %18 : vector<16x1xf32> to vector<16x32xf32>
    %20 = arith.mulf %15, %19 : vector<16x32xf32>
    %21 = vector.broadcast %1 : vector<1x32xf32> to vector<16x32xf32>
    %22 = arith.mulf %20, %21 : vector<16x32xf32>
    %23 = vector.broadcast %2 : vector<1x32xf32> to vector<16x32xf32>
    %24 = arith.addf %22, %23 : vector<16x32xf32>
    %c0_9 = arith.constant 0 : index
    %c0_10 = arith.constant 0 : index
    %25 = vector.load %arg4[%c0_9, %c0_10] : memref<32x96xf32, #tpu.memory_space<vmem>>, vector<32x96xf32>
    %cst_11 = arith.constant dense<0.000000e+00> : vector<16x96xf32>
    %26 = tpu.matmul %24, %25, %cst_11 {dimension_numbers = #tpu.dot_dimension_numbers<[1], [0], [0], [1], [0, 0, 1, 1], [], []>} : vector<16x32xf32>, vector<32x96xf32>, vector<16x96xf32> -> vector<16x96xf32>
    %c0_12 = arith.constant 0 : index
    %c0_13 = arith.constant 0 : index
    %27 = vector.load %arg5[%c0_12, %c0_13] : memref<1x96xf32, #tpu.memory_space<vmem>>, vector<1x96xf32>
    %28 = vector.broadcast %27 : vector<1x96xf32> to vector<16x96xf32>
    %29 = arith.addf %26, %28 : vector<16x96xf32>
    %30 = vector.shape_cast %29 : vector<16x96xf32> to vector<2x8x96xf32>
    %31 = vector.extract_strided_slice %30 {offsets = [0, 0, 0], sizes = [2, 8, 8], strides = [1, 1, 1]} : vector<2x8x96xf32> to vector<2x8x8xf32>
    %32 = vector.extract_strided_slice %30 {offsets = [0, 0, 32], sizes = [2, 8, 8], strides = [1, 1, 1]} : vector<2x8x96xf32> to vector<2x8x8xf32>
    %33 = vector.extract_strided_slice %30 {offsets = [0, 0, 64], sizes = [2, 8, 8], strides = [1, 1, 1]} : vector<2x8x96xf32> to vector<2x8x8xf32>
    "tpu.trace_start"() <{level = 10 : i32, message = "bqe,bke->bqk"}> : () -> ()
    %cst_14 = arith.constant dense<0.000000e+00> : vector<2x8x8xf32>
    %34 = tpu.matmul %31, %32, %cst_14 {dimension_numbers = #tpu.dot_dimension_numbers<[2], [2], [1], [1], [0, 0, 0, 1, 1, 1], [0], [0]>} : vector<2x8x8xf32>, vector<2x8x8xf32>, vector<2x8x8xf32> -> vector<2x8x8xf32>
    "tpu.trace_stop"() : () -> ()
    %cst_15 = arith.constant dense<0xFF800000> : vector<2x8xf32>
    %35 = vector.multi_reduction <maximumf>, %34, %cst_15 [2] : vector<2x8x8xf32> to vector<2x8xf32>
    %36 = vector.shape_cast %35 : vector<2x8xf32> to vector<2x8x1xf32>
    %37 = vector.broadcast %36 : vector<2x8x1xf32> to vector<2x8x8xf32>
    %38 = arith.subf %34, %37 : vector<2x8x8xf32>
    %39 = math.exp %38 : vector<2x8x8xf32>
    %cst_16 = arith.constant dense<0.000000e+00> : vector<2x8xf32>
    %40 = vector.multi_reduction <add>, %39, %cst_16 [2] : vector<2x8x8xf32> to vector<2x8xf32>
    %41 = vector.shape_cast %40 : vector<2x8xf32> to vector<2x8x1xf32>
    %42 = tpu.reciprocal %41 {approx = true} : vector<2x8x1xf32> -> vector<2x8x1xf32>
    %43 = vector.broadcast %42 : vector<2x8x1xf32> to vector<2x8x8xf32>
    %44 = arith.mulf %39, %43 : vector<2x8x8xf32>
    "tpu.trace_start"() <{level = 10 : i32, message = "bqk,bke->bqe"}> : () -> ()
    %cst_17 = arith.constant dense<0.000000e+00> : vector<2x8x8xf32>
    %45 = tpu.matmul %44, %33, %cst_17 {dimension_numbers = #tpu.dot_dimension_numbers<[2], [1], [1], [2], [0, 0, 0, 1, 1, 2], [0], [0]>} : vector<2x8x8xf32>, vector<2x8x8xf32>, vector<2x8x8xf32> -> vector<2x8x8xf32>
    "tpu.trace_stop"() : () -> ()
    %46 = vector.extract_strided_slice %30 {offsets = [0, 0, 8], sizes = [2, 8, 8], strides = [1, 1, 1]} : vector<2x8x96xf32> to vector<2x8x8xf32>
    %47 = vector.extract_strided_slice %30 {offsets = [0, 0, 40], sizes = [2, 8, 8], strides = [1, 1, 1]} : vector<2x8x96xf32> to vector<2x8x8xf32>
    %48 = vector.extract_strided_slice %30 {offsets = [0, 0, 72], sizes = [2, 8, 8], strides = [1, 1, 1]} : vector<2x8x96xf32> to vector<2x8x8xf32>
    "tpu.trace_start"() <{level = 10 : i32, message = "bqe,bke->bqk"}> : () -> ()
    %cst_18 = arith.constant dense<0.000000e+00> : vector<2x8x8xf32>
    %49 = tpu.matmul %46, %47, %cst_18 {dimension_numbers = #tpu.dot_dimension_numbers<[2], [2], [1], [1], [0, 0, 0, 1, 1, 1], [0], [0]>} : vector<2x8x8xf32>, vector<2x8x8xf32>, vector<2x8x8xf32> -> vector<2x8x8xf32>
    "tpu.trace_stop"() : () -> ()
    %cst_19 = arith.constant dense<0xFF800000> : vector<2x8xf32>
    %50 = vector.multi_reduction <maximumf>, %49, %cst_19 [2] : vector<2x8x8xf32> to vector<2x8xf32>
    %51 = vector.shape_cast %50 : vector<2x8xf32> to vector<2x8x1xf32>
    %52 = vector.broadcast %51 : vector<2x8x1xf32> to vector<2x8x8xf32>
    %53 = arith.subf %49, %52 : vector<2x8x8xf32>
    %54 = math.exp %53 : vector<2x8x8xf32>
    %cst_20 = arith.constant dense<0.000000e+00> : vector<2x8xf32>
    %55 = vector.multi_reduction <add>, %54, %cst_20 [2] : vector<2x8x8xf32> to vector<2x8xf32>
    %56 = vector.shape_cast %55 : vector<2x8xf32> to vector<2x8x1xf32>
    %57 = tpu.reciprocal %56 {approx = true} : vector<2x8x1xf32> -> vector<2x8x1xf32>
    %58 = vector.broadcast %57 : vector<2x8x1xf32> to vector<2x8x8xf32>
    %59 = arith.mulf %54, %58 : vector<2x8x8xf32>
    "tpu.trace_start"() <{level = 10 : i32, message = "bqk,bke->bqe"}> : () -> ()
    %cst_21 = arith.constant dense<0.000000e+00> : vector<2x8x8xf32>
    %60 = tpu.matmul %59, %48, %cst_21 {dimension_numbers = #tpu.dot_dimension_numbers<[2], [1], [1], [2], [0, 0, 0, 1, 1, 2], [0], [0]>} : vector<2x8x8xf32>, vector<2x8x8xf32>, vector<2x8x8xf32> -> vector<2x8x8xf32>
    "tpu.trace_stop"() : () -> ()
    %61 = vector.extract_strided_slice %30 {offsets = [0, 0, 16], sizes = [2, 8, 8], strides = [1, 1, 1]} : vector<2x8x96xf32> to vector<2x8x8xf32>
    %62 = vector.extract_strided_slice %30 {offsets = [0, 0, 48], sizes = [2, 8, 8], strides = [1, 1, 1]} : vector<2x8x96xf32> to vector<2x8x8xf32>
    %63 = vector.extract_strided_slice %30 {offsets = [0, 0, 80], sizes = [2, 8, 8], strides = [1, 1, 1]} : vector<2x8x96xf32> to vector<2x8x8xf32>
    "tpu.trace_start"() <{level = 10 : i32, message = "bqe,bke->bqk"}> : () -> ()
    %cst_22 = arith.constant dense<0.000000e+00> : vector<2x8x8xf32>
    %64 = tpu.matmul %61, %62, %cst_22 {dimension_numbers = #tpu.dot_dimension_numbers<[2], [2], [1], [1], [0, 0, 0, 1, 1, 1], [0], [0]>} : vector<2x8x8xf32>, vector<2x8x8xf32>, vector<2x8x8xf32> -> vector<2x8x8xf32>
    "tpu.trace_stop"() : () -> ()
    %cst_23 = arith.constant dense<0xFF800000> : vector<2x8xf32>
    %65 = vector.multi_reduction <maximumf>, %64, %cst_23 [2] : vector<2x8x8xf32> to vector<2x8xf32>
    %66 = vector.shape_cast %65 : vector<2x8xf32> to vector<2x8x1xf32>
    %67 = vector.broadcast %66 : vector<2x8x1xf32> to vector<2x8x8xf32>
    %68 = arith.subf %64, %67 : vector<2x8x8xf32>
    %69 = math.exp %68 : vector<2x8x8xf32>
    %cst_24 = arith.constant dense<0.000000e+00> : vector<2x8xf32>
    %70 = vector.multi_reduction <add>, %69, %cst_24 [2] : vector<2x8x8xf32> to vector<2x8xf32>
    %71 = vector.shape_cast %70 : vector<2x8xf32> to vector<2x8x1xf32>
    %72 = tpu.reciprocal %71 {approx = true} : vector<2x8x1xf32> -> vector<2x8x1xf32>
    %73 = vector.broadcast %72 : vector<2x8x1xf32> to vector<2x8x8xf32>
    %74 = arith.mulf %69, %73 : vector<2x8x8xf32>
    "tpu.trace_start"() <{level = 10 : i32, message = "bqk,bke->bqe"}> : () -> ()
    %cst_25 = arith.constant dense<0.000000e+00> : vector<2x8x8xf32>
    %75 = tpu.matmul %74, %63, %cst_25 {dimension_numbers = #tpu.dot_dimension_numbers<[2], [1], [1], [2], [0, 0, 0, 1, 1, 2], [0], [0]>} : vector<2x8x8xf32>, vector<2x8x8xf32>, vector<2x8x8xf32> -> vector<2x8x8xf32>
    "tpu.trace_stop"() : () -> ()
    %76 = vector.extract_strided_slice %30 {offsets = [0, 0, 24], sizes = [2, 8, 8], strides = [1, 1, 1]} : vector<2x8x96xf32> to vector<2x8x8xf32>
    %77 = vector.extract_strided_slice %30 {offsets = [0, 0, 56], sizes = [2, 8, 8], strides = [1, 1, 1]} : vector<2x8x96xf32> to vector<2x8x8xf32>
    %78 = vector.extract_strided_slice %30 {offsets = [0, 0, 88], sizes = [2, 8, 8], strides = [1, 1, 1]} : vector<2x8x96xf32> to vector<2x8x8xf32>
    "tpu.trace_start"() <{level = 10 : i32, message = "bqe,bke->bqk"}> : () -> ()
    %cst_26 = arith.constant dense<0.000000e+00> : vector<2x8x8xf32>
    %79 = tpu.matmul %76, %77, %cst_26 {dimension_numbers = #tpu.dot_dimension_numbers<[2], [2], [1], [1], [0, 0, 0, 1, 1, 1], [0], [0]>} : vector<2x8x8xf32>, vector<2x8x8xf32>, vector<2x8x8xf32> -> vector<2x8x8xf32>
    "tpu.trace_stop"() : () -> ()
    %cst_27 = arith.constant dense<0xFF800000> : vector<2x8xf32>
    %80 = vector.multi_reduction <maximumf>, %79, %cst_27 [2] : vector<2x8x8xf32> to vector<2x8xf32>
    %81 = vector.shape_cast %80 : vector<2x8xf32> to vector<2x8x1xf32>
    %82 = vector.broadcast %81 : vector<2x8x1xf32> to vector<2x8x8xf32>
    %83 = arith.subf %79, %82 : vector<2x8x8xf32>
    %84 = math.exp %83 : vector<2x8x8xf32>
    %cst_28 = arith.constant dense<0.000000e+00> : vector<2x8xf32>
    %85 = vector.multi_reduction <add>, %84, %cst_28 [2] : vector<2x8x8xf32> to vector<2x8xf32>
    %86 = vector.shape_cast %85 : vector<2x8xf32> to vector<2x8x1xf32>
    %87 = tpu.reciprocal %86 {approx = true} : vector<2x8x1xf32> -> vector<2x8x1xf32>
    %88 = vector.broadcast %87 : vector<2x8x1xf32> to vector<2x8x8xf32>
    %89 = arith.mulf %84, %88 : vector<2x8x8xf32>
    "tpu.trace_start"() <{level = 10 : i32, message = "bqk,bke->bqe"}> : () -> ()
    %cst_29 = arith.constant dense<0.000000e+00> : vector<2x8x8xf32>
    %90 = tpu.matmul %89, %78, %cst_29 {dimension_numbers = #tpu.dot_dimension_numbers<[2], [1], [1], [2], [0, 0, 0, 1, 1, 2], [0], [0]>} : vector<2x8x8xf32>, vector<2x8x8xf32>, vector<2x8x8xf32> -> vector<2x8x8xf32>
    "tpu.trace_stop"() : () -> ()
    %91 = tpu.concatenate %45, %60, %75, %90 in 2 : vector<2x8x8xf32>, vector<2x8x8xf32>, vector<2x8x8xf32>, vector<2x8x8xf32> -> vector<2x8x32xf32>
    %92 = vector.shape_cast %91 : vector<2x8x32xf32> to vector<16x32xf32>
    %c0_30 = arith.constant 0 : index
    %c0_31 = arith.constant 0 : index
    %93 = vector.load %arg6[%c0_30, %c0_31] : memref<32x32xf32, #tpu.memory_space<vmem>>, vector<32x32xf32>
    %cst_32 = arith.constant dense<0.000000e+00> : vector<16x32xf32>
    %94 = tpu.matmul %92, %93, %cst_32 {dimension_numbers = #tpu.dot_dimension_numbers<[1], [0], [0], [1], [0, 0, 1, 1], [], []>} : vector<16x32xf32>, vector<32x32xf32>, vector<16x32xf32> -> vector<16x32xf32>
    %c0_33 = arith.constant 0 : index
    %c0_34 = arith.constant 0 : index
    %95 = vector.load %arg7[%c0_33, %c0_34] : memref<1x32xf32, #tpu.memory_space<vmem>>, vector<1x32xf32>
    %96 = vector.broadcast %95 : vector<1x32xf32> to vector<16x32xf32>
    %97 = arith.addf %94, %96 : vector<16x32xf32>
    %cst_35 = arith.constant 0.000000e+00 : f32
    %98 = vector.broadcast %cst_35 : f32 to vector<16x32xf32>
    %99 = arith.subf %98, %97 : vector<16x32xf32>
    %100 = math.exp %99 : vector<16x32xf32>
    %cst_36 = arith.constant 1.000000e+00 : f32
    %101 = vector.broadcast %cst_36 : f32 to vector<16x32xf32>
    %102 = arith.addf %101, %100 : vector<16x32xf32>
    %103 = tpu.reciprocal %102 {approx = true} : vector<16x32xf32> -> vector<16x32xf32>
    %104 = arith.mulf %97, %103 : vector<16x32xf32>
    %105 = arith.addf %0, %104 : vector<16x32xf32>
    %c0_37 = arith.constant 0 : index
    %c0_38 = arith.constant 0 : index
    %106 = vector.load %arg8[%c0_37, %c0_38] : memref<1x32xf32, #tpu.memory_space<vmem>>, vector<1x32xf32>
    %c0_39 = arith.constant 0 : index
    %c0_40 = arith.constant 0 : index
    %107 = vector.load %arg9[%c0_39, %c0_40] : memref<1x32xf32, #tpu.memory_space<vmem>>, vector<1x32xf32>
    %cst_41 = arith.constant dense<0.000000e+00> : vector<16xf32>
    %108 = vector.multi_reduction <add>, %105, %cst_41 [1] : vector<16x32xf32> to vector<16xf32>
    %109 = vector.shape_cast %108 : vector<16xf32> to vector<16x1xf32>
    %cst_42 = arith.constant 3.200000e+01 : f32
    %110 = vector.broadcast %cst_42 : f32 to vector<16x1xf32>
    %111 = arith.divf %109, %110 : vector<16x1xf32>
    %112 = vector.broadcast %111 : vector<16x1xf32> to vector<16x32xf32>
    %113 = arith.subf %105, %112 : vector<16x32xf32>
    %114 = arith.mulf %113, %113 : vector<16x32xf32>
    %cst_43 = arith.constant dense<0.000000e+00> : vector<16xf32>
    %115 = vector.multi_reduction <add>, %114, %cst_43 [1] : vector<16x32xf32> to vector<16xf32>
    %116 = vector.shape_cast %115 : vector<16xf32> to vector<16x1xf32>
    %cst_44 = arith.constant 3.200000e+01 : f32
    %117 = vector.broadcast %cst_44 : f32 to vector<16x1xf32>
    %118 = arith.divf %116, %117 : vector<16x1xf32>
    %119 = vector.broadcast %111 : vector<16x1xf32> to vector<16x32xf32>
    %120 = arith.subf %105, %119 : vector<16x32xf32>
    %cst_45 = arith.constant 9.99999974E-6 : f32
    %121 = vector.broadcast %cst_45 : f32 to vector<16x1xf32>
    %122 = arith.addf %118, %121 : vector<16x1xf32>
    %123 = math.rsqrt %122 : vector<16x1xf32>
    %124 = vector.broadcast %123 : vector<16x1xf32> to vector<16x32xf32>
    %125 = arith.mulf %120, %124 : vector<16x32xf32>
    %126 = vector.broadcast %106 : vector<1x32xf32> to vector<16x32xf32>
    %127 = arith.mulf %125, %126 : vector<16x32xf32>
    %128 = vector.broadcast %107 : vector<1x32xf32> to vector<16x32xf32>
    %129 = arith.addf %127, %128 : vector<16x32xf32>
    %c0_46 = arith.constant 0 : index
    %c0_47 = arith.constant 0 : index
    %130 = vector.load %arg10[%c0_46, %c0_47] : memref<32x32xf32, #tpu.memory_space<vmem>>, vector<32x32xf32>
    %cst_48 = arith.constant dense<0.000000e+00> : vector<16x32xf32>
    %131 = tpu.matmul %129, %130, %cst_48 {dimension_numbers = #tpu.dot_dimension_numbers<[1], [0], [0], [1], [0, 0, 1, 1], [], []>} : vector<16x32xf32>, vector<32x32xf32>, vector<16x32xf32> -> vector<16x32xf32>
    %c0_49 = arith.constant 0 : index
    %c0_50 = arith.constant 0 : index
    %132 = vector.load %arg11[%c0_49, %c0_50] : memref<1x32xf32, #tpu.memory_space<vmem>>, vector<1x32xf32>
    %133 = vector.broadcast %132 : vector<1x32xf32> to vector<16x32xf32>
    %134 = arith.addf %131, %133 : vector<16x32xf32>
    %cst_51 = arith.constant 0.000000e+00 : f32
    %135 = vector.broadcast %cst_51 : f32 to vector<16x32xf32>
    %136 = arith.subf %135, %134 : vector<16x32xf32>
    %137 = math.exp %136 : vector<16x32xf32>
    %cst_52 = arith.constant 1.000000e+00 : f32
    %138 = vector.broadcast %cst_52 : f32 to vector<16x32xf32>
    %139 = arith.addf %138, %137 : vector<16x32xf32>
    %140 = tpu.reciprocal %139 {approx = true} : vector<16x32xf32> -> vector<16x32xf32>
    %141 = arith.mulf %134, %140 : vector<16x32xf32>
    %142 = arith.addf %105, %141 : vector<16x32xf32>
    %c0_53 = arith.constant 0 : index
    %c0_54 = arith.constant 0 : index
    %143 = vector.load %arg12[%c0_53, %c0_54] : memref<16x32xf32, #tpu.memory_space<vmem>>, vector<16x32xf32>
    tpu.vector_store %arg12[%c0_53, %c0_54], %142 {strides = array<i32>} : memref<16x32xf32, #tpu.memory_space<vmem>>, vector<16x32xf32>,
    return
  }
  func.func @transform_0(%arg0: i32) -> (i32, i32) {
    %c0_i32 = arith.constant 0 : i32
    %c0_i32_0 = arith.constant 0 : i32
    return %arg0, %c0_i32 : i32, i32
  }
  func.func @transform_1(%arg0: i32) -> (i32, i32) {
    %c0_i32 = arith.constant 0 : i32
    %c0_i32_0 = arith.constant 0 : i32
    %c0_i32_1 = arith.constant 0 : i32
    return %c0_i32, %c0_i32_0 : i32, i32
  }
  func.func @transform_2(%arg0: i32) -> (i32, i32) {
    %c0_i32 = arith.constant 0 : i32
    %c0_i32_0 = arith.constant 0 : i32
    %c0_i32_1 = arith.constant 0 : i32
    return %c0_i32, %c0_i32_0 : i32, i32
  }
  func.func @transform_3(%arg0: i32) -> (i32, i32) {
    %c0_i32 = arith.constant 0 : i32
    %c0_i32_0 = arith.constant 0 : i32
    %c0_i32_1 = arith.constant 0 : i32
    return %c0_i32, %c0_i32_0 : i32, i32
  }
  func.func @transform_4(%arg0: i32) -> (i32, i32) {
    %c0_i32 = arith.constant 0 : i32
    %c0_i32_0 = arith.constant 0 : i32
    %c0_i32_1 = arith.constant 0 : i32
    return %c0_i32, %c0_i32_0 : i32, i32
  }
  func.func @transform_5(%arg0: i32) -> (i32, i32) {
    %c0_i32 = arith.constant 0 : i32
    %c0_i32_0 = arith.constant 0 : i32
    %c0_i32_1 = arith.constant 0 : i32
    return %c0_i32, %c0_i32_0 : i32, i32
  }
  func.func @transform_6(%arg0: i32) -> (i32, i32) {
    %c0_i32 = arith.constant 0 : i32
    %c0_i32_0 = arith.constant 0 : i32
    %c0_i32_1 = arith.constant 0 : i32
    return %c0_i32, %c0_i32_0 : i32, i32
  }
  func.func @transform_7(%arg0: i32) -> (i32, i32) {
    %c0_i32 = arith.constant 0 : i32
    %c0_i32_0 = arith.constant 0 : i32
    %c0_i32_1 = arith.constant 0 : i32
    return %c0_i32, %c0_i32_0 : i32, i32
  }
  func.func @transform_8(%arg0: i32) -> (i32, i32) {
    %c0_i32 = arith.constant 0 : i32
    %c0_i32_0 = arith.constant 0 : i32
    %c0_i32_1 = arith.constant 0 : i32
    return %c0_i32, %c0_i32_0 : i32, i32
  }
  func.func @transform_9(%arg0: i32) -> (i32, i32) {
    %c0_i32 = arith.constant 0 : i32
    %c0_i32_0 = arith.constant 0 : i32
    %c0_i32_1 = arith.constant 0 : i32
    return %c0_i32, %c0_i32_0 : i32, i32
  }
  func.func @transform_10(%arg0: i32) -> (i32, i32) {
    %c0_i32 = arith.constant 0 : i32
    %c0_i32_0 = arith.constant 0 : i32
    %c0_i32_1 = arith.constant 0 : i32
    return %c0_i32, %c0_i32_0 : i32, i32
  }
  func.func @transform_11(%arg0: i32) -> (i32, i32) {
    %c0_i32 = arith.constant 0 : i32
    %c0_i32_0 = arith.constant 0 : i32
    return %arg0, %c0_i32 : i32, i32
  }
}

</mosaic_0001>

<bundles_post_ra>
// kernel: tpu_custom_call.1
= control target key start
LH: loop header
LB: loop body
LE: loop exit
PB: predicated region body
PF: predicated region fallthrough
CT: control target
= control target key end

     0   :  { %16 = vsyncpa [#allocation3], 0  ;;  %s2782_s0 = inlined_call_operand.hbm [shape: f32[16,32], index: 0, kind: input, shape index: {}]   ;;  %s2783_s1 = inlined_call_operand.vmem [shape: f32[1,32], index: 1, kind: input, shape index: {}]   ;;  %s2784_s2 = inlined_call_operand.vmem [shape: f32[1,32], index: 2, kind: input, shape index: {}]   ;;  %s2785_s3 = inlined_call_operand.hbm [shape: f32[32,96], index: 3, kind: input, shape index: {}]   ;;  %s2786_s4 = inlined_call_operand.hbm [shape: f32[1,96], index: 4, kind: input, shape index: {}]   ;;  %s2787_s5 = inlined_call_operand.hbm [shape: f32[32,32], index: 5, kind: input, shape index: {}]   ;;  %s2788_s6 = inlined_call_operand.hbm [shape: f32[1,32], index: 6, kind: input, shape index: {}]   ;;  %s2789_s7 = inlined_call_operand.hbm [shape: f32[1,32], index: 7, kind: input, shape index: {}]   ;;  %s2790_s8 = inlined_call_operand.hbm [shape: f32[1,32], index: 8, kind: input, shape index: {}]   ;;  %s2791_s9 = inlined_call_operand.vmem [shape: f32[32,32], index: 9, kind: input, shape index: {}]   ;;  %s2792_s10 = inlined_call_operand.vmem [shape: f32[1,32], index: 10, kind: input, shape index: {}]   ;;  %s2793_s11 = inlined_call_operand.hbm [shape: f32[16,32], index: 11, kind: output, shape index: {}]  }
   0x1   :  { %17 = vsyncpa [#allocation6], 0 }
   0x2   :  { %18 = vsyncpa [#allocation9], 0 }
   0x3   :  { %19 = vsyncpa [#allocation12], 0 }
   0x4   :  { %20 = vsyncpa [#allocation4], 0  ;;  %s2386_s17 = smov [#allocation5]   ;;  %s2387_s19 = smov [#allocation8]  }
   0x5   :  { %s42_s18 = sshll.u32 %s2386_s17, 4  ;;  %s64_s20 = sshll.u32 %s2387_s19, 4  ;;  %s43_s18 = int_to_ptr.vmem [resolvable:$true] %s42_s18  ;;  %s2471_s20 = int_to_ptr.vmem [resolvable:$true] %s64_s20 }
   0x6   :  { %s2200_s23 = scalar_lea.hbm %s2785_s3, 512 }
   0x7   :  { %p2201_p0 = scmp.ne.s32.totalorder %s2785_s3, %s2200_s23  ;;  %p2204_p1 = scmp.lt.u32.totalorder %s2200_s23, %s2785_s3 }
   0x9   :  { %p2206_p2 = pnand %p2204_p1, %p2201_p0 }
   0xb   :  { %2209 = shalt.err (!%p2206_p2)
}
   0xc   :  { %s2210_s28 = scalar_lea.vmem %s43_s18, 512  ;;  %p2215_p4 = scmp.lt.s32.totalorder %s43_s18, %s43_s18 }
   0xd   :  { %p2211_p3 = scmp.ne.s32.totalorder %s43_s18, %s2210_s28  ;;  %p2216_p5 = scmp.lt.s32.totalorder %s2210_s28, %s2210_s28 }
   0xf   :  { %p2217_p6 = por %p2216_p5, %p2215_p4 }
  0x11   :  { %p2218_p7 = pnand %p2217_p6, %p2211_p3 }
  0x13   :  { %2221 = shalt.err (!%p2218_p7)
}
  0x14   :  { %s2388_s29 = smov 128   ;;  %s2389_s30 = smov 8  }
  0x15   :  { %48 = dma.hbm_to_vmem [thread:$0]  %s2785_s3, 512, %s43_s18, [#allocation6], %s2388_s29, %s2388_s29, %s2389_s30  }
  0x16   :  { %s2222_s16 = scalar_lea.hbm %s2787_s5, 512 }
  0x17   :  { %p2223_p8 = scmp.ne.s32.totalorder %s2787_s5, %s2222_s16  ;;  %p2226_p9 = scmp.lt.u32.totalorder %s2222_s16, %s2787_s5 }
  0x19   :  { %p2228_p10 = pnand %p2226_p9, %p2223_p8 }
  0x1b   :  { %2231 = shalt.err (!%p2228_p10)
}
  0x1c   :  { %s2232_s23 = scalar_lea.vmem %s2471_s20, 512  ;;  %p2237_p12 = scmp.lt.s32.totalorder %s2471_s20, %s2471_s20 }
  0x1d   :  { %p2233_p11 = scmp.ne.s32.totalorder %s2471_s20, %s2232_s23  ;;  %p2238_p13 = scmp.lt.s32.totalorder %s2232_s23, %s2232_s23 }
  0x1f   :  { %p2239_p0 = por %p2238_p13, %p2237_p12 }
  0x21   :  { %p2240_p1 = pnand %p2239_p0, %p2233_p11 }
  0x23   :  { %2243 = shalt.err (!%p2240_p1)
}
  0x24   :  { %70 = dma.hbm_to_vmem [thread:$0]  %s2787_s5, 512, %s2471_s20, [#allocation9], %s2388_s29, %s2388_s29, %s2389_s30  }
  0x25   :  { %s2390_s24 = smov [#allocation11]   ;;  %s2391_s26 = smov [#allocation2]  }
  0x26   :  { %s87_s25 = sshll.u32 %s2390_s24, 4  ;;  %s26_s27 = sshll.u32 %s2391_s26, 4  ;;  %s88_s25 = int_to_ptr.vmem [resolvable:$true] %s87_s25  ;;  %s2508_s27 = int_to_ptr.vmem [resolvable:$true] %s26_s27 }
  0x27   :  { %s2244_s13 = scalar_lea.hbm %s2789_s7, 16 }
  0x28   :  { %p2245_p2 = scmp.ne.s32.totalorder %s2789_s7, %s2244_s13  ;;  %p2248_p3 = scmp.lt.u32.totalorder %s2244_s13, %s2789_s7 }
  0x2a   :  { %p2250_p4 = pnand %p2248_p3, %p2245_p2 }
  0x2c   :  { %2253 = shalt.err (!%p2250_p4)
}
  0x2d   :  { %s2254_s5 = scalar_lea.vmem %s88_s25, 16  ;;  %s2258_s20 = scalar_lea.vmem %s88_s25, 32 }
  0x2e   :  { %p2255_p5 = scmp.ne.s32.totalorder %s88_s25, %s2254_s5  ;;  %p2259_p6 = scmp.lt.s32.totalorder %s88_s25, %s88_s25 }
  0x2f   :  { %p2260_p7 = scmp.lt.s32.totalorder %s2258_s20, %s2254_s5 }
  0x31   :  { %p2261_p8 = por %p2260_p7, %p2259_p6 }
  0x33   :  { %p2262_p9 = pnand %p2261_p8, %p2255_p5 }
  0x35   :  { %2265 = shalt.err (!%p2262_p9)
}
  0x36   :  { %90 = dma.hbm_to_vmem [thread:$0]  %s2789_s7, 16, %s88_s25, [#allocation12]  }
  0x37   :  { %s2266_s3 = scalar_lea.hbm %s2782_s0, 256 }
  0x38   :  { %p2267_p10 = scmp.ne.s32.totalorder %s2782_s0, %s2266_s3  ;;  %p2270_p11 = scmp.lt.u32.totalorder %s2266_s3, %s2782_s0 }
  0x3a   :  { %p2272_p12 = pnand %p2270_p11, %p2267_p10 }
  0x3c   :  { %2275 = shalt.err (!%p2272_p12)
}
  0x3d   :  { %s2276_s12 = scalar_lea.vmem %s2508_s27, 256  ;;  %p2281_p0 = scmp.lt.s32.totalorder %s2508_s27, %s2508_s27 }
  0x3e   :  { %p2277_p13 = scmp.ne.s32.totalorder %s2508_s27, %s2276_s12  ;;  %p2282_p1 = scmp.lt.s32.totalorder %s2276_s12, %s2276_s12 }
  0x40   :  { %p2283_p2 = por %p2282_p1, %p2281_p0 }
  0x42   :  { %p2284_p3 = pnand %p2283_p2, %p2277_p13 }
  0x44   :  { %2287 = shalt.err (!%p2284_p3)
}
  0x45   :  { %32 = dma.hbm_to_vmem [thread:$0]  %s2782_s0, 256, %s2508_s27, [#allocation3], %s2388_s29, %s2388_s29, %s2389_s30  }
  0x46   :  { %s2392_s13 = smov [#allocation7]   ;;  %s2393_s15 = smov [#allocation10]  }
  0x47   :  { %s55_s14 = sshll.u32 %s2392_s13, 4  ;;  %s77_s16 = sshll.u32 %s2393_s15, 4  ;;  %s56_s14 = int_to_ptr.vmem [resolvable:$true] %s55_s14  ;;  %s78_s16 = int_to_ptr.vmem [resolvable:$true] %s77_s16 }
  0x48   :  { %s2288_s20 = scalar_lea.hbm %s2786_s4, 16 }
  0x49   :  { %p2289_p4 = scmp.ne.s32.totalorder %s2786_s4, %s2288_s20  ;;  %p2292_p5 = scmp.lt.u32.totalorder %s2288_s20, %s2786_s4 }
  0x4b   :  { %p2294_p6 = pnand %p2292_p5, %p2289_p4 }
  0x4d   :  { %2297 = shalt.err (!%p2294_p6)
}
  0x4e   :  { %s2298_s0 = scalar_lea.vmem %s56_s14, 16  ;;  %s2302_s27 = scalar_lea.vmem %s56_s14, 32 }
  0x4f   :  { %p2299_p7 = scmp.ne.s32.totalorder %s56_s14, %s2298_s0  ;;  %p2303_p8 = scmp.lt.s32.totalorder %s56_s14, %s56_s14 }
  0x50   :  { %p2304_p9 = scmp.lt.s32.totalorder %s2302_s27, %s2298_s0 }
  0x52   :  { %p2305_p10 = por %p2304_p9, %p2303_p8 }
  0x54   :  { %p2306_p11 = pnand %p2305_p10, %p2299_p7 }
  0x56   :  { %2309 = shalt.err (!%p2306_p11)
}
  0x57   :  { %58 = dma.hbm_to_vmem [thread:$0]  %s2786_s4, 16, %s56_s14, [#allocation6]  }
  0x58   :  { %s2310_s28 = scalar_lea.hbm %s2788_s6, 16 }
  0x59   :  { %p2311_p12 = scmp.ne.s32.totalorder %s2788_s6, %s2310_s28  ;;  %p2314_p13 = scmp.lt.u32.totalorder %s2310_s28, %s2788_s6 }
  0x5b   :  { %p2316_p0 = pnand %p2314_p13, %p2311_p12 }
  0x5d   :  { %2319 = shalt.err (!%p2316_p0)
}
  0x5e   :  { %s2320_s15 = scalar_lea.vmem %s78_s16, 16  ;;  %s2324_s17 = scalar_lea.vmem %s78_s16, 32 }
  0x5f   :  { %p2321_p1 = scmp.ne.s32.totalorder %s78_s16, %s2320_s15  ;;  %p2325_p2 = scmp.lt.s32.totalorder %s78_s16, %s78_s16 }
  0x60   :  { %p2326_p3 = scmp.lt.s32.totalorder %s2324_s17, %s2320_s15 }
  0x62   :  { %p2327_p4 = por %p2326_p3, %p2325_p2 }
  0x64   :  { %p2328_p5 = pnand %p2327_p4, %p2321_p1 }
  0x66   :  { %2331 = shalt.err (!%p2328_p5)
}
  0x67   :  { %80 = dma.hbm_to_vmem [thread:$0]  %s2788_s6, 16, %s78_s16, [#allocation9]  }
  0x68   :  { %s2394_s5 = smov [#allocation13]   ;;  %s2332_s22 = scalar_lea.hbm %s2790_s8, 16 }
  0x69   :  { %s97_s20 = sshll.u32 %s2394_s5, 4  ;;  %p2333_p6 = scmp.ne.s32.totalorder %s2790_s8, %s2332_s22  ;;  %s98_s20 = int_to_ptr.vmem [resolvable:$true] %s97_s20 }
  0x6a   :  { %p2336_p7 = scmp.lt.u32.totalorder %s2332_s22, %s2790_s8 }
  0x6c   :  { %p2338_p8 = pnand %p2336_p7, %p2333_p6 }
  0x6e   :  { %2341 = shalt.err (!%p2338_p8)
}
  0x6f   :  { %s2342_s18 = scalar_lea.vmem %s98_s20, 16  ;;  %s2346_s6 = scalar_lea.vmem %s98_s20, 32 }
  0x70   :  { %p2343_p9 = scmp.ne.s32.totalorder %s98_s20, %s2342_s18  ;;  %p2347_p10 = scmp.lt.s32.totalorder %s98_s20, %s98_s20 }
  0x71   :  { %p2348_p11 = scmp.lt.s32.totalorder %s2346_s6, %s2342_s18 }
  0x73   :  { %p2349_p12 = por %p2348_p11, %p2347_p10 }
  0x75   :  { %p2350_p13 = pnand %p2349_p12, %p2343_p9 }
  0x77   :  { %2353 = shalt.err (!%p2350_p13)
}
  0x78   :  { %100 = dma.hbm_to_vmem [thread:$0]  %s2790_s8, 16, %s98_s20, [#allocation12]  }
  0x79   :  { %2376 = dma.done.wait [#allocation3], 256  }
  0x7a   :  { %2377 = vsyncadd [#allocation3], 4294967040 }
  0x7b   :  { %2378 = dma.done.wait [#allocation6], 528  }
  0x7c   :  { %2379 = vsyncadd [#allocation6], 4294966768 }
  0x7d   :  { %2380 = dma.done.wait [#allocation9], 528  }
  0x7e   :  { %2381 = vsyncadd [#allocation9], 4294966768 }
  0x7f   :  { %2382 = dma.done.wait [#allocation12], 32  }
  0x80   :  { %2383 = vsyncadd [#allocation12], 4294967264  ;;  %vm130_vm0 = vcmask 261120   ;;  %v2578_v0 = vld [vmem:[#allocation2] sm:$0xff]  ;;  %v2580_v1 = vld [vmem:[#allocation2 + $0x8] sm:$0xff]  ;;  %v2395_v36 = vmov 0.0  }
  0x81   :  { %v131_v2 = vsel %vm130_vm0, %v2578_v0, 0.0  ;;  %v134_v3 = vsel %vm130_vm0, %v2580_v1, 0.0  ;;  %v174_v14 = vld [vmem:[#allocation5] sm:$0xff]  ;;  %v175_v15 = vld [vmem:[#allocation5 + $0x8] sm:$0xff]  ;;  %v176_v16 = vld [vmem:[#allocation5 + $0x10] sm:$0xff]  ;;  %1993 = vmatprep.subr.mxu1 %v2395_v36  ;;  %vm2396_vm1 = vmmov 0  }
  0x82   :  { %132 = vadd.xlane.f32.xlu0 %v131_v2  ;;  %v2095_v17 = vpack.c.bf16 %v175_v15, %v174_v14  ;;  %v177_v18 = vld [vmem:[#allocation5 + $0x18] sm:$0xff]  ;;  %v1895_v27 = vld [vmem:[%s2783_s1] ss:$0 sm:$0xff]  ;;  %1995 = vmatprep.mubr.msk.f32.mxu1 %vm2396_vm1, %v2395_v36  ;;  %v1897_v37 = vld [vmem:[#allocation7] ss:$0 sm:$0xff]  ;;  %s2397_s1 = smov 96  }
  0x83   :  { %v2099_v19 = vpack.c.bf16 %v177_v18, %v176_v16  ;;  %v1896_v29 = vld [vmem:[%s2784_s2] ss:$0 sm:$0xff]  ;;  %vm269_vm2 = vcmask 64512   ;;  %s2398_s2 = smov 64   ;;  %s2399_s7 = smov 88   ;;  %vm1614_vm3 = vcmask 195584  }
  0x84   :  { %2096 = vmatprep.subr.bf16.mxu0 %v2095_v17  ;;  %s2400_s25 = smov 120   ;;  %s2401_s13 = smov 56   ;;  %vm1611_vm4 = vcmask 130048  }
  0x85   :  { %2098 = vmatpush3.bf16.msra.mxu0 %v2095_v17  ;;  %s2402_s15 = smov 80   ;;  %s2403_s17 = smov 112  }
  0x86   :  { %135 = vadd.xlane.f32.xlu0 %v134_v3  ;;  %2100 = vmatprep.subr.bf16.mxu0 %v2099_v19  ;;  %s2404_s4 = smov 48   ;;  %s2405_s14 = smov 72  }
  0x87   :  { %s2406_s5 = smov 104   ;;  %s2407_s20 = smov 40  }
  0x88   :  { %s2408_s19 = smov 16   ;;  %s2409_s21 = smov 24  }
  0x89   :  { %2102 = vmatpush3.bf16.msra.mxu0 %v2099_v19 }
  0x8a   :  { %2003 = vmatprep.subr.mxu0 %v2395_v36 }
 0x10f   :  { %v133_v4 = vpop.xlane.xlu0 %132 }
 0x110   :  { %v138_v5 = vmul.f32 0.03125, %v133_v4 }
 0x112   :  { %v140_v6 = vsub.f32 %v2578_v0, %v138_v5 }
 0x113   :  { %v136_v7 = vpop.xlane.xlu0 %135 }
 0x114   :  { %v139_v8 = vmul.f32 0.03125, %v136_v7  ;;  %v142_v9 = vmul.f32 %v140_v6, %v140_v6 }
 0x116   :  { %v141_v10 = vsub.f32 %v2580_v1, %v139_v8  ;;  %v144_v11 = vsel %vm130_vm0, %v142_v9, 0.0 }
 0x117   :  { %145 = vadd.xlane.f32.xlu1 %v144_v11 }
 0x118   :  { %v143_v12 = vmul.f32 %v141_v10, %v141_v10 }
 0x11a   :  { %v147_v13 = vsel %vm130_vm0, %v143_v12, 0.0 }
 0x11b   :  { %148 = vadd.xlane.f32.xlu1 %v147_v13 }
 0x1a4   :  { %v146_v20 = vpop.xlane.xlu1 %145 }
 0x1a5   :  { %v150_v21 = vmul.f32 0.03125, %v146_v20 }
 0x1a7   :  { %v152_v22 = vadd.f32 1e-05, %v150_v21 }
 0x1a8   :  { %v149_v23 = vpop.xlane.xlu1 %148 }
 0x1a9   :  { %2144 = vrsqrt.f32 %v152_v22  ;;  %v151_v24 = vmul.f32 0.03125, %v149_v23 }
 0x1ab   :  { %v153_v25 = vadd.f32 1e-05, %v151_v24 }
 0x1ad   :  { %2146 = vrsqrt.f32 %v153_v25 }
 0x1b3   :  { %v2145_v26 = vpop.eup %2144 }
 0x1b4   :  { %v156_v28 = vmul.f32 %v2145_v26, %v140_v6 }
 0x1b6   :  { %v164_v30 = vmul.f32 %v1895_v27, %v156_v28 }
 0x1b7   :  { %v2147_v31 = vpop.eup %2146 }
 0x1b8   :  { %v157_v32 = vmul.f32 %v2147_v31, %v141_v10  ;;  %v172_v33 = vadd.f32 %v1896_v29, %v164_v30 }
 0x1ba   :  { %v165_v34 = vmul.f32 %v1895_v27, %v157_v32  ;;  %1990 = vmatprep.mubr.msk.f32.mxu0 %vm130_vm0, %v172_v33 }
 0x1bc   :  { %v173_v35 = vadd.f32 %v1896_v29, %v165_v34 }
 0x1be   :  { %1991 = vmatmul.mubr.msk.f32.vlgmr.msra.gmra.mrb[0].mxu0 %vm130_vm0, %v173_v35 }
 0x1bf   :  { %2005 = vmatprep.mubr.msk.f32.mxu0 %vm2396_vm1, %v2395_v36 }
 0x291   :  { %v1992_v38 = vpop.f32.mrb[0].mxu0 }
 0x292   :  { %v2604_v39 = vadd.f32 %v1992_v38, %v1897_v37  ;;  %v257_v40 = vpop.f32.mrb[1].mxu0 }
 0x293   :  { %v2606_v41 = vadd.f32 %v1897_v37, %v257_v40 }
 0x294   :  { %345 = vrot.lane.b32.xlu1 %v2604_v39, %s2397_s1 }
 0x295   :  { %267 = vrot.lane.b32.xlu0 %v2606_v41, %s2397_s1 }
 0x306   :  { %v346_v43 = vpop.permute.xlu1 %345 }
 0x307   :  { %v268_v42 = vpop.permute.xlu0 %267 }
 0x308   :  { %1994 = vmatpush3.xpose.msk.msra.mxu1 %vm269_vm2, %v268_v42 }
 0x309   :  { %1998 = vmatprep.subr.mxu1 %v2395_v36 }
 0x30b   :  { %1996 = vmatmul.mubr.msk.f32.vlgmr.msra.gmra.mrb[0].mxu1 %vm269_vm2, %v2606_v41 }
 0x30c   :  { %1999 = vmatpush3.xpose.msk.msra.mxu1 %vm269_vm2, %v346_v43  ;;  %2000 = vmatprep.mubr.msk.f32.mxu1 %vm2396_vm1, %v2395_v36 }
 0x30d   :  { %2008 = vmatprep.subr.mxu1 %v2395_v36 }
 0x30f   :  { %2001 = vmatmul.mubr.msk.f32.vlgmr.msra.gmra.mrb[2].mxu1 %vm269_vm2, %v2604_v39 }
 0x310   :  { %2010 = vmatprep.mubr.msk.f32.mxu1 %vm2396_vm1, %v2395_v36 }
 0x3de   :  { %v340_v44 = vpop.f32.mrb[0].mxu1 }
 0x3df   :  { %v1997_v45 = vpop.f32.mrb[1].mxu1  ;;  %v421_v46 = vsel %vm269_vm2, %v340_v44, -inf }
 0x3e0   :  { %422 = vmax.xlane.f32.xlu1 %v421_v46 }
 0x3e2   :  { %v417_v47 = vpop.f32.mrb[2].mxu1 }
 0x3e3   :  { %v2002_v48 = vpop.f32.mrb[3].mxu1  ;;  %v424_v49 = vsel %vm269_vm2, %v417_v47, -inf }
 0x3e4   :  { %425 = vmax.xlane.f32.xlu0 %v424_v49 }
 0x3f1   :  { %519 = vrot.lane.b32.xlu1 %v2604_v39, %s2398_s2 }
 0x3f5   :  { %597 = vrot.lane.b32.xlu1 %v2606_v41, %s2399_s7 }
 0x3f9   :  { %675 = vrot.lane.b32.xlu1 %v2604_v39, %s2399_s7 }
 0x3fa   :  { %443 = vrot.lane.b32.xlu0 %v2606_v41, %s2398_s2 }
 0x46d   :  { %v423_v50 = vpop.xlane.xlu1 %422 }
 0x46e   :  { %v427_v51 = vsub.f32 %v340_v44, %v423_v50 }
 0x470   :  { %v429_v52 = vmul.f32 1.442695, %v427_v51 }
 0x471   :  { %v520_v53 = vpop.permute.xlu1 %519  ;;  %v426_v54 = vpop.xlane.xlu0 %425 }
 0x472   :  { %2148 = vpow2.f32 %v429_v52  ;;  %v428_v55 = vsub.f32 %v417_v47, %v426_v54  ;;  %2009 = vmatpush3.msra.mxu1 %v520_v53 }
 0x473   :  { %2018 = vmatprep.subr.mxu1 %v2395_v36 }
 0x474   :  { %v431_v56 = vmul.f32 1.442695, %v428_v55 }
 0x475   :  { %v444_v57 = vpop.permute.xlu0 %443  ;;  %v598_v62 = vpop.permute.xlu1 %597 }
 0x476   :  { %2150 = vpow2.f32 %v431_v56  ;;  %2004 = vmatpush3.msra.mxu0 %v444_v57 }
 0x477   :  { %2013 = vmatprep.subr.mxu0 %v2395_v36 }
 0x479   :  { %v676_v63 = vpop.permute.xlu1 %675 }
 0x47c   :  { %v2149_v58 = vpop.eup %2148 }
 0x47d   :  { %v433_v59 = vsel %vm269_vm2, %v2149_v58, 0.0 }
 0x47e   :  { %434 = vadd.xlane.f32.xlu0 %v433_v59 }
 0x480   :  { %v2151_v60 = vpop.eup %2150 }
 0x481   :  { %v436_v61 = vsel %vm269_vm2, %v2151_v60, 0.0 }
 0x482   :  { %437 = vadd.xlane.f32.xlu1 %v436_v61 }
 0x493   :  { %673 = vrot.lane.b32.xlu1 %v2604_v39, %s2400_s25 }
 0x494   :  { %595 = vrot.lane.b32.xlu0 %v2606_v41, %s2400_s25 }
 0x50b   :  { %v435_v2 = vpop.xlane.xlu0 %434 }
 0x50c   :  { %2152 = vrcp.f32 %v435_v2 }
 0x50f   :  { %v438_v3 = vpop.xlane.xlu1 %437  ;;  %v596_v8 = vpop.permute.xlu0 %595 }
 0x510   :  { %2154 = vrcp.f32 %v438_v3 }
 0x513   :  { %v674_v9 = vpop.permute.xlu1 %673 }
 0x516   :  { %v2153_v4 = vpop.eup %2152 }
 0x517   :  { %v441_v5 = vmul.f32 %v2153_v4, %v2149_v58 }
 0x519   :  { %2006 = vmatmul.mubr.msk.f32.vlgmr.msra.gmra.mrb[2].mxu0 %vm269_vm2, %v441_v5 }
 0x51a   :  { %v2155_v6 = vpop.eup %2154  ;;  %2014 = vmatpush3.xpose.msk.msra.mxu0 %vm269_vm2, %v598_v62  ;;  %2015 = vmatprep.mubr.msk.f32.mxu0 %vm2396_vm1, %v2395_v36 }
 0x51b   :  { %v442_v7 = vmul.f32 %v2155_v6, %v2151_v60  ;;  %2023 = vmatprep.subr.mxu0 %v2395_v36 }
 0x51d   :  { %2011 = vmatmul.mubr.msk.f32.vlgmr.msra.gmra.mrb[4].mxu1 %vm269_vm2, %v442_v7  ;;  %2016 = vmatmul.mubr.msk.f32.vlgmr.msra.gmra.mrb[4].mxu0 %vm269_vm2, %v596_v8 }
 0x51e   :  { %2019 = vmatpush3.xpose.msk.msra.mxu1 %vm269_vm2, %v676_v63  ;;  %2020 = vmatprep.mubr.msk.f32.mxu1 %vm2396_vm1, %v2395_v36 }
 0x51f   :  { %2028 = vmatprep.subr.mxu1 %v2395_v36  ;;  %2025 = vmatprep.mubr.msk.f32.mxu0 %vm2396_vm1, %v2395_v36 }
 0x521   :  { %2021 = vmatmul.mubr.msk.f32.vlgmr.msra.gmra.mrb[6].mxu1 %vm269_vm2, %v674_v9 }
 0x522   :  { %2030 = vmatprep.mubr.msk.f32.mxu1 %vm2396_vm1, %v2395_v36 }
 0x5ec   :  { %v2650_v10 = vpop.f32.mrb[2].mxu0 }
 0x5ed   :  { %v2007_v11 = vpop.f32.mrb[3].mxu0 }
 0x5f0   :  { %v2652_v12 = vpop.f32.mrb[4].mxu1  ;;  %v669_v13 = vpop.f32.mrb[4].mxu0 }
 0x5f1   :  { %v2012_v14 = vpop.f32.mrb[5].mxu1  ;;  %v2017_v15 = vpop.f32.mrb[5].mxu0  ;;  %v751_v16 = vsel %vm269_vm2, %v669_v13, -inf }
 0x5f2   :  { %752 = vmax.xlane.f32.xlu0 %v751_v16 }
 0x5f4   :  { %v747_v17 = vpop.f32.mrb[6].mxu1 }
 0x5f5   :  { %v2022_v18 = vpop.f32.mrb[7].mxu1  ;;  %v754_v19 = vsel %vm269_vm2, %v747_v17, -inf }
 0x5f6   :  { %755 = vmax.xlane.f32.xlu1 %v754_v19 }
 0x607   :  { %849 = vrot.lane.b32.xlu1 %v2604_v39, %s2401_s13 }
 0x608   :  { %773 = vrot.lane.b32.xlu0 %v2606_v41, %s2401_s13 }
 0x60b   :  { %927 = vrot.lane.b32.xlu1 %v2606_v41, %s2402_s15 }
 0x60f   :  { %1005 = vrot.lane.b32.xlu1 %v2604_v39, %s2402_s15 }
 0x613   :  { %1003 = vrot.lane.b32.xlu1 %v2604_v39, %s2403_s17 }
 0x67f   :  { %v753_v20 = vpop.xlane.xlu0 %752 }
 0x680   :  { %v757_v21 = vsub.f32 %v669_v13, %v753_v20 }
 0x682   :  { %v759_v22 = vmul.f32 1.442695, %v757_v21 }
 0x683   :  { %v774_v23 = vpop.permute.xlu0 %773  ;;  %v756_v24 = vpop.xlane.xlu1 %755 }
 0x684   :  { %2156 = vpow2.f32 %v759_v22  ;;  %v758_v25 = vsub.f32 %v747_v17, %v756_v24  ;;  %2024 = vmatpush3.msra.mxu0 %v774_v23 }
 0x685   :  { %2033 = vmatprep.subr.mxu0 %v2395_v36 }
 0x686   :  { %v761_v26 = vmul.f32 1.442695, %v758_v25 }
 0x687   :  { %v850_v27 = vpop.permute.xlu1 %849 }
 0x688   :  { %2158 = vpow2.f32 %v761_v26  ;;  %2029 = vmatpush3.msra.mxu1 %v850_v27 }
 0x689   :  { %2038 = vmatprep.subr.mxu1 %v2395_v36 }
 0x68b   :  { %v928_v34 = vpop.permute.xlu1 %927 }
 0x68e   :  { %v2157_v28 = vpop.eup %2156 }
 0x68f   :  { %v763_v29 = vsel %vm269_vm2, %v2157_v28, 0.0  ;;  %v1006_v40 = vpop.permute.xlu1 %1005 }
 0x690   :  { %764 = vadd.xlane.f32.xlu0 %v763_v29 }
 0x692   :  { %v2159_v30 = vpop.eup %2158 }
 0x693   :  { %v766_v31 = vsel %vm269_vm2, %v2159_v30, 0.0  ;;  %v1004_v44 = vpop.permute.xlu1 %1003 }
 0x694   :  { %767 = vadd.xlane.f32.xlu0 %v766_v31 }
 0x6aa   :  { %925 = vrot.lane.b32.xlu0 %v2606_v41, %s2403_s17 }
 0x71d   :  { %v765_v32 = vpop.xlane.xlu0 %764 }
 0x71e   :  { %2160 = vrcp.f32 %v765_v32 }
 0x721   :  { %v768_v33 = vpop.xlane.xlu0 %767 }
 0x722   :  { %2162 = vrcp.f32 %v768_v33 }
 0x725   :  { %v926_v43 = vpop.permute.xlu0 %925 }
 0x728   :  { %v2161_v35 = vpop.eup %2160 }
 0x729   :  { %v771_v37 = vmul.f32 %v2161_v35, %v2157_v28 }
 0x72b   :  { %2026 = vmatmul.mubr.msk.f32.vlgmr.msra.gmra.mrb[6].mxu0 %vm269_vm2, %v771_v37 }
 0x72c   :  { %v2163_v38 = vpop.eup %2162  ;;  %2034 = vmatpush3.xpose.msk.msra.mxu0 %vm269_vm2, %v928_v34  ;;  %2035 = vmatprep.mubr.msk.f32.mxu0 %vm2396_vm1, %v2395_v36 }
 0x72d   :  { %v772_v42 = vmul.f32 %v2163_v38, %v2159_v30  ;;  %2043 = vmatprep.subr.mxu0 %v2395_v36 }
 0x72f   :  { %2031 = vmatmul.mubr.msk.f32.vlgmr.msra.gmra.mrb[8].mxu1 %vm269_vm2, %v772_v42  ;;  %2036 = vmatmul.mubr.msk.f32.vlgmr.msra.gmra.mrb[8].mxu0 %vm269_vm2, %v926_v43 }
 0x730   :  { %2039 = vmatpush3.xpose.msk.msra.mxu1 %vm269_vm2, %v1006_v40  ;;  %2040 = vmatprep.mubr.msk.f32.mxu1 %vm2396_vm1, %v2395_v36 }
 0x731   :  { %2048 = vmatprep.subr.mxu1 %v2395_v36  ;;  %2045 = vmatprep.mubr.msk.f32.mxu0 %vm2396_vm1, %v2395_v36 }
 0x733   :  { %2041 = vmatmul.mubr.msk.f32.vlgmr.msra.gmra.mrb[10].mxu1 %vm269_vm2, %v1004_v44 }
 0x734   :  { %2050 = vmatprep.mubr.msk.f32.mxu1 %vm2396_vm1, %v2395_v36 }
 0x7fe   :  { %v2682_v45 = vpop.f32.mrb[6].mxu0 }
 0x7ff   :  { %v2027_v46 = vpop.f32.mrb[7].mxu0 }
 0x800   :  { %v1617_v46 = vld [vmem:[#allocation8] sm:$0xff] }
 0x802   :  { %v2684_v47 = vpop.f32.mrb[8].mxu1  ;;  %v999_v48 = vpop.f32.mrb[8].mxu0 }
 0x803   :  { %v2032_v49 = vpop.f32.mrb[9].mxu1  ;;  %v2037_v50 = vpop.f32.mrb[9].mxu0  ;;  %v1081_v51 = vsel %vm269_vm2, %v999_v48, -inf }
 0x804   :  { %1082 = vmax.xlane.f32.xlu0 %v1081_v51  ;;  %v1620_v49 = vld [vmem:[#allocation8 + $0x18] sm:$0xff] }
 0x806   :  { %v1077_v52 = vpop.f32.mrb[10].mxu1 }
 0x807   :  { %v2042_v53 = vpop.f32.mrb[11].mxu1  ;;  %v1084_v54 = vsel %vm269_vm2, %v1077_v52, -inf }
 0x808   :  { %1085 = vmax.xlane.f32.xlu1 %v1084_v54 }
 0x819   :  { %1179 = vrot.lane.b32.xlu1 %v2604_v39, %s2404_s4 }
 0x81a   :  { %1103 = vrot.lane.b32.xlu0 %v2606_v41, %s2404_s4 }
 0x81d   :  { %1257 = vrot.lane.b32.xlu1 %v2606_v41, %s2405_s14 }
 0x821   :  { %1335 = vrot.lane.b32.xlu1 %v2604_v39, %s2405_s14 }
 0x825   :  { %1333 = vrot.lane.b32.xlu1 %v2604_v39, %s2406_s5 }
 0x891   :  { %v1083_v55 = vpop.xlane.xlu0 %1082 }
 0x892   :  { %v1087_v56 = vsub.f32 %v999_v48, %v1083_v55 }
 0x894   :  { %v1089_v57 = vmul.f32 1.442695, %v1087_v56 }
 0x895   :  { %v1104_v58 = vpop.permute.xlu0 %1103  ;;  %v1086_v59 = vpop.xlane.xlu1 %1085 }
 0x896   :  { %2164 = vpow2.f32 %v1089_v57  ;;  %v1088_v60 = vsub.f32 %v1077_v52, %v1086_v59  ;;  %2044 = vmatpush3.msra.mxu0 %v1104_v58 }
 0x897   :  { %2053 = vmatprep.subr.mxu0 %v2395_v36 }
 0x898   :  { %v1091_v61 = vmul.f32 1.442695, %v1088_v60 }
 0x899   :  { %v1180_v62 = vpop.permute.xlu1 %1179 }
 0x89a   :  { %2166 = vpow2.f32 %v1091_v61  ;;  %2049 = vmatpush3.msra.mxu1 %v1180_v62 }
 0x89b   :  { %2058 = vmatprep.subr.mxu1 %v2395_v36 }
 0x89d   :  { %v1258_v7 = vpop.permute.xlu1 %1257 }
 0x8a0   :  { %v2165_v63 = vpop.eup %2164 }
 0x8a1   :  { %v1093_v2 = vsel %vm269_vm2, %v2165_v63, 0.0  ;;  %v1336_v13 = vpop.permute.xlu1 %1335 }
 0x8a2   :  { %1094 = vadd.xlane.f32.xlu0 %v1093_v2 }
 0x8a4   :  { %v2167_v3 = vpop.eup %2166 }
 0x8a5   :  { %v1096_v4 = vsel %vm269_vm2, %v2167_v3, 0.0  ;;  %v1334_v16 = vpop.permute.xlu1 %1333 }
 0x8a6   :  { %1097 = vadd.xlane.f32.xlu0 %v1096_v4 }
 0x8bc   :  { %1255 = vrot.lane.b32.xlu0 %v2606_v41, %s2406_s5 }
 0x92f   :  { %v1095_v5 = vpop.xlane.xlu0 %1094 }
 0x930   :  { %2168 = vrcp.f32 %v1095_v5  ;;  %v1924_v5 = vld [vmem:[#allocation10] ss:$0 sm:$0xff] }
 0x933   :  { %v1098_v6 = vpop.xlane.xlu0 %1097 }
 0x934   :  { %2170 = vrcp.f32 %v1098_v6 }
 0x937   :  { %v1256_v15 = vpop.permute.xlu0 %1255 }
 0x93a   :  { %v2169_v8 = vpop.eup %2168 }
 0x93b   :  { %v1101_v9 = vmul.f32 %v2169_v8, %v2165_v63 }
 0x93d   :  { %2046 = vmatmul.mubr.msk.f32.vlgmr.msra.gmra.mrb[10].mxu0 %vm269_vm2, %v1101_v9 }
 0x93e   :  { %v2171_v11 = vpop.eup %2170  ;;  %2054 = vmatpush3.xpose.msk.msra.mxu0 %vm269_vm2, %v1258_v7  ;;  %2055 = vmatprep.mubr.msk.f32.mxu0 %vm2396_vm1, %v2395_v36 }
 0x93f   :  { %v1102_v14 = vmul.f32 %v2171_v11, %v2167_v3  ;;  %2063 = vmatprep.subr.mxu0 %v2395_v36 }
 0x941   :  { %2051 = vmatmul.mubr.msk.f32.vlgmr.msra.gmra.mrb[12].mxu1 %vm269_vm2, %v1102_v14  ;;  %2056 = vmatmul.mubr.msk.f32.vlgmr.msra.gmra.mrb[12].mxu0 %vm269_vm2, %v1256_v15 }
 0x942   :  { %2059 = vmatpush3.xpose.msk.msra.mxu1 %vm269_vm2, %v1336_v13  ;;  %2060 = vmatprep.mubr.msk.f32.mxu1 %vm2396_vm1, %v2395_v36 }
 0x943   :  { %2068 = vmatprep.subr.mxu1 %v2395_v36  ;;  %2065 = vmatprep.mubr.msk.f32.mxu0 %vm2396_vm1, %v2395_v36 }
 0x945   :  { %2061 = vmatmul.mubr.msk.f32.vlgmr.msra.gmra.mrb[14].mxu1 %vm269_vm2, %v1334_v16 }
 0x946   :  { %2070 = vmatprep.mubr.msk.f32.mxu1 %vm2396_vm1, %v2395_v36 }
 0xa10   :  { %v1175_v17 = vpop.f32.mrb[10].mxu0 }
 0xa11   :  { %v2047_v18 = vpop.f32.mrb[11].mxu0 }
 0xa14   :  { %v1251_v19 = vpop.f32.mrb[12].mxu1  ;;  %v1329_v20 = vpop.f32.mrb[12].mxu0 }
 0xa15   :  { %v2052_v21 = vpop.f32.mrb[13].mxu1  ;;  %v2057_v22 = vpop.f32.mrb[13].mxu0  ;;  %v1411_v23 = vsel %vm269_vm2, %v1329_v20, -inf }
 0xa16   :  { %1412 = vmax.xlane.f32.xlu0 %v1411_v23 }
 0xa18   :  { %v1407_v24 = vpop.f32.mrb[14].mxu1 }
 0xa19   :  { %v2062_v25 = vpop.f32.mrb[15].mxu1  ;;  %v1414_v26 = vsel %vm269_vm2, %v1407_v24, -inf }
 0xa1a   :  { %1415 = vmax.xlane.f32.xlu1 %v1414_v26 }
 0xa2b   :  { %1509 = vrot.lane.b32.xlu1 %v2604_v39, %s2407_s20 }
 0xa2f   :  { %1587 = vrot.lane.b32.xlu1 %v2682_v45, %s2389_s30 }
 0xa33   :  { %1589 = vrot.lane.b32.xlu1 %v2684_v47, %s2389_s30  ;;  %v1618_v47 = vld [vmem:[#allocation8 + $0x8] sm:$0xff] }
 0xa34   :  { %v2103_v48 = vpack.c.bf16 %v1618_v47, %v1617_v46 }
 0xa37   :  { %1597 = vrot.lane.b32.xlu1 %v1251_v19, %s2408_s19 }
 0xaa3   :  { %v1413_v36 = vpop.xlane.xlu0 %1412 }
 0xaa4   :  { %v1417_v27 = vsub.f32 %v1329_v20, %v1413_v36 }
 0xaa6   :  { %v1419_v28 = vmul.f32 1.442695, %v1417_v27 }
 0xaa7   :  { %v1416_v29 = vpop.xlane.xlu1 %1415 }
 0xaa8   :  { %2172 = vpow2.f32 %v1419_v28  ;;  %v1418_v30 = vsub.f32 %v1407_v24, %v1416_v29 }
 0xaaa   :  { %v1421_v31 = vmul.f32 1.442695, %v1418_v30 }
 0xaab   :  { %v1510_v32 = vpop.permute.xlu1 %1509 }
 0xaac   :  { %2174 = vpow2.f32 %v1421_v31  ;;  %2069 = vmatpush3.msra.mxu1 %v1510_v32 }
 0xaaf   :  { %v1588_v55 = vpop.permute.xlu1 %1587 }
 0xab0   :  { %v1609_v58 = vsel %vm269_vm2, %v2650_v10, %v1588_v55 }
 0xab2   :  { %v2173_v33 = vpop.eup %2172 }
 0xab3   :  { %v1423_v39 = vsel %vm269_vm2, %v2173_v33, 0.0  ;;  %v1590_v56 = vpop.permute.xlu1 %1589 }
 0xab4   :  { %1424 = vadd.xlane.f32.xlu0 %v1423_v39  ;;  %v1610_v63 = vsel %vm269_vm2, %v2652_v12, %v1590_v56  ;;  %v1768_v39 = vld [vmem:[%s2791_s9 + $0x8] sm:$0xff]  ;;  %v1929_v56 = vld [vmem:[%s2792_s10] ss:$0 sm:$0xff]  ;;  %s2410_s10 = smov [#allocation14]  }
 0xab5   :  { %s1880_s8 = sshll.u32 %s2410_s10, 4  ;;  %s1881_s8 = int_to_ptr.vmem [resolvable:$true] %s1880_s8 }
 0xab6   :  { %v2175_v34 = vpop.eup %2174  ;;  %s2354_s26 = scalar_lea.vmem %s1881_s8, 256  ;;  %p2359_p1 = scmp.lt.s32.totalorder %s1881_s8, %s1881_s8 }
 0xab7   :  { %v1426_v35 = vsel %vm269_vm2, %v2175_v34, 0.0  ;;  %v1598_v59 = vpop.permute.xlu1 %1597  ;;  %p2355_p0 = scmp.ne.s32.totalorder %s1881_s8, %s2354_s26  ;;  %p2360_p2 = scmp.lt.s32.totalorder %s2354_s26, %s2354_s26 }
 0xab8   :  { %1427 = vadd.xlane.f32.xlu0 %v1426_v35  ;;  %v1613_v2 = vsel %vm1611_vm4, %v1610_v63, %v1598_v59  ;;  %v1769_v35 = vld [vmem:[%s2791_s9 + $0x10] sm:$0xff] }
 0xab9   :  { %p2361_p3 = por %p2360_p2, %p2359_p1 }
 0xabb   :  { %p2362_p4 = pnand %p2361_p3, %p2355_p0 }
 0xace   :  { %1433 = vrot.lane.b32.xlu0 %v2606_v41, %s2407_s20  ;;  %v1619_v41 = vld [vmem:[#allocation8 + $0x10] sm:$0xff] }
 0xacf   :  { %v2107_v50 = vpack.c.bf16 %v1620_v49, %v1619_v41  ;;  %v1928_v49 = vld [vmem:[#allocation13] ss:$0 sm:$0xff] }
 0xad2   :  { %1595 = vrot.lane.b32.xlu0 %v1175_v17, %s2408_s19 }
 0xb41   :  { %v1425_v37 = vpop.xlane.xlu0 %1424 }
 0xb42   :  { %2176 = vrcp.f32 %v1425_v37  ;;  %v1770_v37 = vld [vmem:[%s2791_s9 + $0x18] sm:$0xff] }
 0xb45   :  { %v1428_v38 = vpop.xlane.xlu0 %1427 }
 0xb46   :  { %2178 = vrcp.f32 %v1428_v38  ;;  %v2115_v38 = vpack.c.bf16 %v1770_v37, %v1769_v35 }
 0xb49   :  { %v1434_v40 = vpop.permute.xlu0 %1433 }
 0xb4a   :  { %2064 = vmatpush3.msra.mxu0 %v1434_v40 }
 0xb4b   :  { %2104 = vmatprep.subr.bf16.mxu0 %v2103_v48 }
 0xb4c   :  { %v2177_v42 = vpop.eup %2176 }
 0xb4d   :  { %v1431_v43 = vmul.f32 %v2177_v42, %v2173_v33  ;;  %v1596_v57 = vpop.permute.xlu0 %1595  ;;  %v1767_v33 = vld [vmem:[%s2791_s9] sm:$0xff] }
 0xb4e   :  { %v1612_v60 = vsel %vm1611_vm4, %v1609_v58, %v1596_v57 }
 0xb4f   :  { %2066 = vmatmul.mubr.msk.f32.vlgmr.msra.gmra.mrb[14].mxu0 %vm269_vm2, %v1431_v43 }
 0xb50   :  { %v2179_v44 = vpop.eup %2178  ;;  %2106 = vmatpush3.bf16.msra.mxu0 %v2103_v48  ;;  %v1927_v48 = vld [vmem:[#allocation11] ss:$0 sm:$0xff] }
 0xb51   :  { %v1432_v45 = vmul.f32 %v2179_v44, %v2175_v34  ;;  %2108 = vmatprep.subr.bf16.mxu0 %v2107_v50  ;;  %v2111_v34 = vpack.c.bf16 %v1768_v39, %v1767_v33 }
 0xb53   :  { %2071 = vmatmul.mubr.msk.f32.vlgmr.msra.gmra.mrb[16].mxu1 %vm269_vm2, %v1432_v45  ;;  %2112 = vmatprep.subr.bf16.mxu1 %v2111_v34 }
 0xb54   :  { %2110 = vmatpush3.bf16.msra.mxu0 %v2107_v50  ;;  %2114 = vmatpush3.bf16.msra.mxu1 %v2111_v34 }
 0xb55   :  { %2116 = vmatprep.subr.bf16.mxu1 %v2115_v38 }
 0xb58   :  { %2118 = vmatpush3.bf16.msra.mxu1 %v2115_v38 }
 0xc22   :  { %v1505_v51 = vpop.f32.mrb[14].mxu0 }
 0xc23   :  { %1603 = vrot.lane.b32.xlu0 %v1505_v51, %s2409_s21  ;;  %v2067_v52 = vpop.f32.mrb[15].mxu0 }
 0xc26   :  { %v1581_v53 = vpop.f32.mrb[16].mxu1 }
 0xc27   :  { %1605 = vrot.lane.b32.xlu1 %v1581_v53, %s2409_s21  ;;  %v2072_v54 = vpop.f32.mrb[17].mxu1 }
 0xc95   :  { %v1604_v61 = vpop.permute.xlu0 %1603 }
 0xc96   :  { %v1615_v62 = vsel %vm1614_vm3, %v1612_v60, %v1604_v61 }
 0xc97   :  { %2081 = vmatprep.mubr.msk.f32.mxu0 %vm130_vm0, %v1615_v62 }
 0xc99   :  { %v1606_v3 = vpop.permute.xlu1 %1605 }
 0xc9a   :  { %v1616_v4 = vsel %vm1614_vm3, %v1613_v2, %v1606_v3 }
 0xc9b   :  { %2082 = vmatmul.mubr.msk.f32.vlgmr.msra.gmra.mrb[16].mxu0 %vm130_vm0, %v1616_v4 }
 0xd6e   :  { %v2083_v6 = vpop.f32.mrb[16].mxu0 }
 0xd6f   :  { %v1706_v7 = vadd.f32 %v2083_v6, %v1924_v5  ;;  %v1700_v8 = vpop.f32.mrb[17].mxu0 }
 0xd70   :  { %v1701_v10 = vadd.f32 %v1924_v5, %v1700_v8 }
 0xd71   :  { %v1710_v9 = vsub.f32 0.0, %v1706_v7 }
 0xd72   :  { %v1709_v11 = vsub.f32 0.0, %v1701_v10 }
 0xd73   :  { %v1713_v13 = vmul.f32 1.442695, %v1710_v9 }
 0xd74   :  { %v1711_v14 = vmul.f32 1.442695, %v1709_v11 }
 0xd75   :  { %2180 = vpow2.f32 %v1713_v13 }
 0xd76   :  { %2182 = vpow2.f32 %v1711_v14 }
 0xd7f   :  { %v2181_v15 = vpop.eup %2180 }
 0xd80   :  { %v2183_v16 = vpop.eup %2182  ;;  %v1716_v17 = vadd.f32 1.0, %v2181_v15 }
 0xd81   :  { %v1715_v12 = vadd.f32 1.0, %v2183_v16 }
 0xd82   :  { %2184 = vrcp.f32 %v1716_v17 }
 0xd83   :  { %2186 = vrcp.f32 %v1715_v12 }
 0xd8c   :  { %v2185_v18 = vpop.eup %2184 }
 0xd8d   :  { %v2187_v19 = vpop.eup %2186  ;;  %v1720_v20 = vmul.f32 %v2185_v18, %v1706_v7 }
 0xd8e   :  { %v1719_v21 = vmul.f32 %v2187_v19, %v1701_v10 }
 0xd8f   :  { %v2733_v22 = vadd.f32 %v1720_v20, %v2580_v1 }
 0xd90   :  { %v2736_v23 = vadd.f32 %v1719_v21, %v2578_v0 }
 0xd91   :  { %v1728_v24 = vsel %vm130_vm0, %v2733_v22, 0.0 }
 0xd92   :  { %1729 = vadd.xlane.f32.xlu1 %v1728_v24  ;;  %v1725_v25 = vsel %vm130_vm0, %v2736_v23, 0.0 }
 0xd93   :  { %1726 = vadd.xlane.f32.xlu0 %v1725_v25 }
 0xe1f   :  { %v1730_v26 = vpop.xlane.xlu1 %1729 }
 0xe20   :  { %v1732_v36 = vmul.f32 0.03125, %v1730_v26  ;;  %v1727_v27 = vpop.xlane.xlu0 %1726 }
 0xe21   :  { %v1731_v28 = vmul.f32 0.03125, %v1727_v27 }
 0xe22   :  { %v1734_v29 = vsub.f32 %v2733_v22, %v1732_v36 }
 0xe23   :  { %v1733_v1 = vsub.f32 %v2736_v23, %v1731_v28 }
 0xe24   :  { %v1736_v31 = vmul.f32 %v1734_v29, %v1734_v29 }
 0xe25   :  { %v1735_v30 = vmul.f32 %v1733_v1, %v1733_v1 }
 0xe26   :  { %v1740_v32 = vsel %vm130_vm0, %v1736_v31, 0.0 }
 0xe27   :  { %v1737_v0 = vsel %vm130_vm0, %v1735_v30, 0.0 }
 0xe28   :  { %1738 = vadd.xlane.f32.xlu0 %v1737_v0 }
 0xe2c   :  { %1741 = vadd.xlane.f32.xlu0 %v1740_v32 }
 0xeb5   :  { %v1739_v40 = vpop.xlane.xlu0 %1738 }
 0xeb6   :  { %v1743_v42 = vmul.f32 0.03125, %v1739_v40 }
 0xeb8   :  { %v1745_v43 = vadd.f32 1e-05, %v1743_v42 }
 0xeb9   :  { %v1742_v44 = vpop.xlane.xlu0 %1741 }
 0xeba   :  { %2188 = vrsqrt.f32 %v1745_v43  ;;  %v1744_v45 = vmul.f32 0.03125, %v1742_v44 }
 0xebc   :  { %v1746_v46 = vadd.f32 1e-05, %v1744_v45 }
 0xebe   :  { %2190 = vrsqrt.f32 %v1746_v46 }
 0xec4   :  { %v2189_v47 = vpop.eup %2188 }
 0xec5   :  { %v1749_v41 = vmul.f32 %v2189_v47, %v1733_v1 }
 0xec7   :  { %v1757_v50 = vmul.f32 %v1927_v48, %v1749_v41 }
 0xec8   :  { %v2191_v51 = vpop.eup %2190 }
 0xec9   :  { %v1750_v52 = vmul.f32 %v2191_v51, %v1734_v29  ;;  %v1765_v53 = vadd.f32 %v1928_v49, %v1757_v50 }
 0xecb   :  { %v1758_v54 = vmul.f32 %v1927_v48, %v1750_v52  ;;  %2092 = vmatprep.mubr.msk.f32.mxu1 %vm130_vm0, %v1765_v53 }
 0xecd   :  { %v1766_v55 = vadd.f32 %v1928_v49, %v1758_v54 }
 0xecf   :  { %2093 = vmatmul.mubr.msk.f32.vlgmr.msra.gmra.mrb[18].mxu1 %vm130_vm0, %v1766_v55 }
 0xfa2   :  { %v2094_v57 = vpop.f32.mrb[18].mxu1 }
 0xfa3   :  { %v1856_v58 = vadd.f32 %v2094_v57, %v1929_v56  ;;  %v1850_v59 = vpop.f32.mrb[19].mxu1 }
 0xfa4   :  { %v1851_v60 = vadd.f32 %v1929_v56, %v1850_v59 }
 0xfa5   :  { %v1860_v61 = vsub.f32 0.0, %v1856_v58 }
 0xfa6   :  { %v1859_v62 = vsub.f32 0.0, %v1851_v60 }
 0xfa7   :  { %v1863_v63 = vmul.f32 1.442695, %v1860_v61 }
 0xfa8   :  { %v1861_v2 = vmul.f32 1.442695, %v1859_v62 }
 0xfa9   :  { %2192 = vpow2.f32 %v1863_v63 }
 0xfaa   :  { %2194 = vpow2.f32 %v1861_v2 }
 0xfb3   :  { %v2193_v3 = vpop.eup %2192 }
 0xfb4   :  { %v2195_v4 = vpop.eup %2194  ;;  %v1866_v5 = vadd.f32 1.0, %v2193_v3 }
 0xfb5   :  { %v1865_v6 = vadd.f32 1.0, %v2195_v4 }
 0xfb6   :  { %2196 = vrcp.f32 %v1866_v5 }
 0xfb7   :  { %2198 = vrcp.f32 %v1865_v6 }
 0xfc0   :  { %v2197_v7 = vpop.eup %2196 }
 0xfc1   :  { %v2199_v8 = vpop.eup %2198  ;;  %v1870_v10 = vmul.f32 %v2197_v7, %v1856_v58 }
 0xfc2   :  { %v1869_v9 = vmul.f32 %v2199_v8, %v1851_v60 }
 0xfc3   :  { %v1872_v11 = vadd.f32 %v1870_v10, %v2733_v22 }
 0xfc4   :  { %v1871_v13 = vadd.f32 %v1869_v9, %v2736_v23 }
 0xfc5   :  { %1874 = vst.msk [vmem:[#allocation14 + $0x8] sm:$0xff] %vm130_vm0, %v1872_v11 }
 0xfc6   :  { %1873 = vst.msk [vmem:[#allocation14] sm:$0xff] %vm130_vm0, %v1871_v13 }
 0xfc7   :  { %2365 = shalt.err (!%p2362_p4)
}
 0xfc8   :  { %s2366_s1 = scalar_lea.hbm %s2793_s11, 256 }
 0xfc9   :  { %p2367_p5 = scmp.ne.s32.totalorder %s2793_s11, %s2366_s1  ;;  %p2370_p6 = scmp.lt.u32.totalorder %s2366_s1, %s2793_s11 }
 0xfcb   :  { %p2372_p7 = pnand %p2370_p6, %p2367_p5 }
 0xfcd   :  { %2375 = shalt.err (!%p2372_p7)
}
 0xfce   :  { %1886 = dma.vmem_to_hbm [thread:$0]  %s1881_s8, 256, %s2793_s11, [#allocation4], %s2388_s29, %s2388_s29, %s2389_s30  }
 0xfcf   :  { %2384 = dma.done.wait [#allocation4], 256  }
 0xfd0   :  { %2385 = vsyncadd [#allocation4], 4294967040 }
 0xfd1   :  { %1890 = vsyncpa [#allocation3], 1 }
 0xfd2   :  { %1891 = vsyncpa [#allocation6], 1 }
 0xfd3   :  { %1892 = vsyncpa [#allocation9], 1 }
 0xfd4   :  { %1893 = vsyncpa [#allocation12], 1 }
 0xfd5   :  { %1894 = vsyncpa [#allocation4], 1 }

</bundles_post_ra>
